<compile_context>
chip_gen: v7x
topology: tpu7x:2x2x1
jax: 0.10.0
libtpu: 0.0.40
codegen_flags: <defaults>
</compile_context>

<pallas_src>
import functools

import jax
import jax.numpy as jnp
from jax.experimental import pallas as pl
from jax.experimental.pallas import tpu as pltpu

_LANES = 128
_SUBLANES = 8


def _round_up(x, m):
    return ((x + m - 1) // m) * m


def pack_params(w1, b1, w2, b2):
    """Flatten w1:(S,H), b1:(1,H), w2:(H,A), b2:(1,A) into one f32 vector for SMEM.

    Layout: [w1 row-major (S*H) | b1 (H) | w2 row-major (H*A) | b2 (A)].
    Call once per parameter update; every forward then needs a single tiny
    scalar-memory transfer for all parameters.
    """
    S, H = w1.shape
    H2, A = w2.shape
    assert H2 == H, "w1/w2 hidden dims disagree"
    packed = jnp.concatenate([
        jnp.reshape(w1.astype(jnp.float32), (-1,)),
        jnp.reshape(b1.astype(jnp.float32), (-1,)),
        jnp.reshape(w2.astype(jnp.float32), (-1,)),
        jnp.reshape(b2.astype(jnp.float32), (-1,)),
    ])
    assert packed.shape[0] == S * H + H + H * A + A
    return packed, (S, H, A)


def _dqn_planar_kernel(p_ref, x_ref, o_ref, *, S, H, A):
    """p_ref: SMEM f32 scalars; x_ref: (S, tr, 128) batch-in-lanes; o_ref: (A, tr, 128)."""
    b1_off = S * H
    w2_off = b1_off + H
    b2_off = w2_off + H * A

    # Dense lane-major batch tiles; every op below uses all 128 lanes of each vreg.
    xs = [x_ref[s] for s in range(S)]
    out_acc = [None] * A
    for k in range(H):                                    # unrolled, H = 12
        h = xs[0] * p_ref[k] + p_ref[b1_off + k]          # w1[0,k] , b1[k]
        for s in range(1, S):                             # unrolled, S = 4
            h = h + xs[s] * p_ref[s * H + k]              # w1[s,k]
        h = jnp.maximum(h, 0.0)                           # ReLU
        for a in range(A):                                # unrolled, A = 2
            t = h * p_ref[w2_off + k * A + a]             # w2[k,a]
            out_acc[a] = t if out_acc[a] is None else out_acc[a] + t
    for a in range(A):
        o_ref[a] = out_acc[a] + p_ref[b2_off + a]         # + b2[a] (lane-dense store)


def cartpole_dqn_forward_packed(x, packed, dims, *, block_rows=16):
    """Forward pass with pre-packed parameters. x:(B,S) -> (B,A)."""
    S, H, A = dims
    B = x.shape[0]
    assert x.shape[1] == S
    assert packed.shape[0] == S * H + H + H * A + A, "packed params do not match dims"
    x = x.astype(jnp.float32)

    # Batch-in-lanes tiling: one lane-row = 128 batch elements.
    block_rows = max(_SUBLANES, _round_up(block_rows, _SUBLANES))
    r = -(-B // _LANES)                      # lane-rows needed
    if r <= block_rows:
        tr = r                               # single tile; block dim == full dim (legal)
        r_pad = r
    else:
        tr = block_rows                      # multiple of 8; >= 2 grid steps (v7x megacore)
        r_pad = _round_up(r, tr)
    bp = r_pad * _LANES
    grid = (r_pad // tr,)

    xt = jnp.transpose(x)                    # (S, B): batch onto the lane axis
    if bp != B:
        xt = jnp.pad(xt, ((0, 0), (0, bp - B)))
    xp = jnp.reshape(xt, (S, r_pad, _LANES))

    kernel = functools.partial(_dqn_planar_kernel, S=S, H=H, A=A)
    cost = pl.CostEstimate(
        flops=2 * bp * (S * H + H * A),
        transcendentals=0,
        bytes_accessed=4 * (S * bp + int(packed.size) + A * bp),
    )

    out_planar = pl.pallas_call(
        kernel,
        out_shape=jax.ShapeDtypeStruct((A, r_pad, _LANES), jnp.float32),
        grid=grid,
        in_specs=[
            pl.BlockSpec(memory_space=pltpu.MemorySpace.SMEM),   # all params as SMEM scalars
            pl.BlockSpec((S, tr, _LANES), lambda i: (0, i, 0)),  # lane-dense x batch tile
        ],
        out_specs=pl.BlockSpec((A, tr, _LANES), lambda i: (0, i, 0)),
        compiler_params=pltpu.CompilerParams(
            dimension_semantics=("parallel",)),                  # v7x: 2 TCs split batch grid
        cost_estimate=cost,
    )(packed, xp)

    q = jnp.reshape(out_planar, (A, bp))[:, :B]                  # drop padded batch columns
    return jnp.transpose(q)                                      # (B, A)


def cartpole_dqn_forward(x, w1, b1, w2, b2, *, block_rows=16):
    """Convenience wrapper matching the original signature (packs params per call).
    For repeated calls (rollout / training loop), call pack_params() once and use
    cartpole_dqn_forward_packed to amortize the packing."""
    packed, dims = pack_params(w1, b1, w2, b2)
    return cartpole_dqn_forward_packed(x, packed, dims, block_rows=block_rows)


def init_params(key, state_dim, action_dim, hidden=12):
    """Deterministic init mimicking PyTorch nn.Linear defaults
    (uniform in [-1/sqrt(fan_in), 1/sqrt(fan_in)]); weights stored as (in, out)."""
    k1, k2, k3, k4 = jax.random.split(key, 4)
    bound1 = 1.0 / jnp.sqrt(jnp.float32(state_dim))
    bound2 = 1.0 / jnp.sqrt(jnp.float32(hidden))
    w1 = jax.random.uniform(k1, (state_dim, hidden), jnp.float32, -bound1, bound1)
    b1 = jax.random.uniform(k2, (1, hidden), jnp.float32, -bound1, bound1)
    w2 = jax.random.uniform(k3, (hidden, action_dim), jnp.float32, -bound2, bound2)
    b2 = jax.random.uniform(k4, (1, action_dim), jnp.float32, -bound2, bound2)
    return w1, b1, w2, b2


# TODO(synk): the DQN action-selection argmax over the A=2 Q-values could be fused into the
# kernel tail as an extra int32 output to save one tiny follow-on dispatch per RL step.

if __name__ == "__main__":
    # CartPole-like dims: state_space_dim=4, action_space_dim=2, hidden=12
    batch, state_dim, action_dim, hidden = 8, 4, 2, 12

    key = jax.random.PRNGKey(0)
    key_x, key_p, key_big = jax.random.split(key, 3)
    x = jax.random.normal(key_x, (batch, state_dim), jnp.float32)
    w1, b1, w2, b2 = init_params(key_p, state_dim, action_dim, hidden)

    # Pack parameters once (amortized across every forward of the RL loop).
    packed, dims = pack_params(w1, b1, w2, b2)
    fwd = jax.jit(functools.partial(cartpole_dqn_forward_packed, dims=dims))

    # Small inference-style batch (single tiny tile).
    out = fwd(x, packed)
    jax.block_until_ready(out)
    ref = jnp.maximum(x @ w1 + b1, 0.0) @ w2 + b2
    assert out.shape == (batch, action_dim)
    assert jnp.allclose(out, ref, atol=1e-5, rtol=1e-5)

    # Replay-buffer-style batch: exercises batch padding + the multi-step "parallel" grid.
    big_b = 3000
    x_big = jax.random.normal(key_big, (big_b, state_dim), jnp.float32)
    out_big = fwd(x_big, packed)
    jax.block_until_ready(out_big)
    ref_big = jnp.maximum(x_big @ w1 + b1, 0.0) @ w2 + b2
    assert out_big.shape == (big_b, action_dim)
    assert jnp.allclose(out_big, ref_big, atol=1e-5, rtol=1e-5)

    print("KERNEL_OK")
</pallas_src>

<mosaic_0001>
module attributes {stable_mosaic.version = 11 : i64} {
  func.func @_dqn_planar_kernel(%arg0: i32, %arg1: memref<86xf32, #tpu.memory_space<smem>>, %arg2: memref<4x1x128xf32, #tpu.memory_space<vmem>>, %arg3: memref<2x1x128xf32, #tpu.memory_space<vmem>>) attributes {dimension_semantics = [#tpu.dimension_semantics<parallel>], iteration_bounds = array<i64: 1>, scalar_prefetch = 0 : i64, scratch_operands = 0 : i64, tpu.core_type = #tpu.core_type<tc>, window_params = [{transform_indices = @transform_0, window_bounds = array<i64: 86>}, {transform_indices = @transform_1, window_bounds = array<i64: 4, 1, 128>}, {transform_indices = @transform_2, window_bounds = array<i64: 2, 1, 128>}]} {
    %c0 = arith.constant 0 : index
    %c0_0 = arith.constant 0 : index
    %c0_1 = arith.constant 0 : index
    %0 = vector.load %arg2[%c0, %c0_0, %c0_1] : memref<4x1x128xf32, #tpu.memory_space<vmem>>, vector<1x1x128xf32>
    %1 = vector.shape_cast %0 : vector<1x1x128xf32> to vector<1x128xf32>
    %c1 = arith.constant 1 : index
    %c0_2 = arith.constant 0 : index
    %c0_3 = arith.constant 0 : index
    %2 = vector.load %arg2[%c1, %c0_2, %c0_3] : memref<4x1x128xf32, #tpu.memory_space<vmem>>, vector<1x1x128xf32>
    %3 = vector.shape_cast %2 : vector<1x1x128xf32> to vector<1x128xf32>
    %c2 = arith.constant 2 : index
    %c0_4 = arith.constant 0 : index
    %c0_5 = arith.constant 0 : index
    %4 = vector.load %arg2[%c2, %c0_4, %c0_5] : memref<4x1x128xf32, #tpu.memory_space<vmem>>, vector<1x1x128xf32>
    %5 = vector.shape_cast %4 : vector<1x1x128xf32> to vector<1x128xf32>
    %c3 = arith.constant 3 : index
    %c0_6 = arith.constant 0 : index
    %c0_7 = arith.constant 0 : index
    %6 = vector.load %arg2[%c3, %c0_6, %c0_7] : memref<4x1x128xf32, #tpu.memory_space<vmem>>, vector<1x1x128xf32>
    %7 = vector.shape_cast %6 : vector<1x1x128xf32> to vector<1x128xf32>
    %c0_8 = arith.constant 0 : index
    %8 = memref.load %arg1[%c0_8] : memref<86xf32, #tpu.memory_space<smem>>
    %9 = vector.broadcast %8 : f32 to vector<1x128xf32>
    %10 = arith.mulf %1, %9 : vector<1x128xf32>
    %c48 = arith.constant 48 : index
    %11 = memref.load %arg1[%c48] : memref<86xf32, #tpu.memory_space<smem>>
    %12 = vector.broadcast %11 : f32 to vector<1x128xf32>
    %13 = arith.addf %10, %12 : vector<1x128xf32>
    %c12 = arith.constant 12 : index
    %14 = memref.load %arg1[%c12] : memref<86xf32, #tpu.memory_space<smem>>
    %15 = vector.broadcast %14 : f32 to vector<1x128xf32>
    %16 = arith.mulf %3, %15 : vector<1x128xf32>
    %17 = arith.addf %13, %16 : vector<1x128xf32>
    %c24 = arith.constant 24 : index
    %18 = memref.load %arg1[%c24] : memref<86xf32, #tpu.memory_space<smem>>
    %19 = vector.broadcast %18 : f32 to vector<1x128xf32>
    %20 = arith.mulf %5, %19 : vector<1x128xf32>
    %21 = arith.addf %17, %20 : vector<1x128xf32>
    %c36 = arith.constant 36 : index
    %22 = memref.load %arg1[%c36] : memref<86xf32, #tpu.memory_space<smem>>
    %23 = vector.broadcast %22 : f32 to vector<1x128xf32>
    %24 = arith.mulf %7, %23 : vector<1x128xf32>
    %25 = arith.addf %21, %24 : vector<1x128xf32>
    %cst = arith.constant 0.000000e+00 : f32
    %26 = vector.broadcast %cst : f32 to vector<1x128xf32>
    %27 = arith.maximumf %25, %26 : vector<1x128xf32>
    %c60 = arith.constant 60 : index
    %28 = memref.load %arg1[%c60] : memref<86xf32, #tpu.memory_space<smem>>
    %29 = vector.broadcast %28 : f32 to vector<1x128xf32>
    %30 = arith.mulf %27, %29 : vector<1x128xf32>
    %c61 = arith.constant 61 : index
    %31 = memref.load %arg1[%c61] : memref<86xf32, #tpu.memory_space<smem>>
    %32 = vector.broadcast %31 : f32 to vector<1x128xf32>
    %33 = arith.mulf %27, %32 : vector<1x128xf32>
    %c1_9 = arith.constant 1 : index
    %34 = memref.load %arg1[%c1_9] : memref<86xf32, #tpu.memory_space<smem>>
    %35 = vector.broadcast %34 : f32 to vector<1x128xf32>
    %36 = arith.mulf %1, %35 : vector<1x128xf32>
    %c49 = arith.constant 49 : index
    %37 = memref.load %arg1[%c49] : memref<86xf32, #tpu.memory_space<smem>>
    %38 = vector.broadcast %37 : f32 to vector<1x128xf32>
    %39 = arith.addf %36, %38 : vector<1x128xf32>
    %c13 = arith.constant 13 : index
    %40 = memref.load %arg1[%c13] : memref<86xf32, #tpu.memory_space<smem>>
    %41 = vector.broadcast %40 : f32 to vector<1x128xf32>
    %42 = arith.mulf %3, %41 : vector<1x128xf32>
    %43 = arith.addf %39, %42 : vector<1x128xf32>
    %c25 = arith.constant 25 : index
    %44 = memref.load %arg1[%c25] : memref<86xf32, #tpu.memory_space<smem>>
    %45 = vector.broadcast %44 : f32 to vector<1x128xf32>
    %46 = arith.mulf %5, %45 : vector<1x128xf32>
    %47 = arith.addf %43, %46 : vector<1x128xf32>
    %c37 = arith.constant 37 : index
    %48 = memref.load %arg1[%c37] : memref<86xf32, #tpu.memory_space<smem>>
    %49 = vector.broadcast %48 : f32 to vector<1x128xf32>
    %50 = arith.mulf %7, %49 : vector<1x128xf32>
    %51 = arith.addf %47, %50 : vector<1x128xf32>
    %cst_10 = arith.constant 0.000000e+00 : f32
    %52 = vector.broadcast %cst_10 : f32 to vector<1x128xf32>
    %53 = arith.maximumf %51, %52 : vector<1x128xf32>
    %c62 = arith.constant 62 : index
    %54 = memref.load %arg1[%c62] : memref<86xf32, #tpu.memory_space<smem>>
    %55 = vector.broadcast %54 : f32 to vector<1x128xf32>
    %56 = arith.mulf %53, %55 : vector<1x128xf32>
    %57 = arith.addf %30, %56 : vector<1x128xf32>
    %c63 = arith.constant 63 : index
    %58 = memref.load %arg1[%c63] : memref<86xf32, #tpu.memory_space<smem>>
    %59 = vector.broadcast %58 : f32 to vector<1x128xf32>
    %60 = arith.mulf %53, %59 : vector<1x128xf32>
    %61 = arith.addf %33, %60 : vector<1x128xf32>
    %c2_11 = arith.constant 2 : index
    %62 = memref.load %arg1[%c2_11] : memref<86xf32, #tpu.memory_space<smem>>
    %63 = vector.broadcast %62 : f32 to vector<1x128xf32>
    %64 = arith.mulf %1, %63 : vector<1x128xf32>
    %c50 = arith.constant 50 : index
    %65 = memref.load %arg1[%c50] : memref<86xf32, #tpu.memory_space<smem>>
    %66 = vector.broadcast %65 : f32 to vector<1x128xf32>
    %67 = arith.addf %64, %66 : vector<1x128xf32>
    %c14 = arith.constant 14 : index
    %68 = memref.load %arg1[%c14] : memref<86xf32, #tpu.memory_space<smem>>
    %69 = vector.broadcast %68 : f32 to vector<1x128xf32>
    %70 = arith.mulf %3, %69 : vector<1x128xf32>
    %71 = arith.addf %67, %70 : vector<1x128xf32>
    %c26 = arith.constant 26 : index
    %72 = memref.load %arg1[%c26] : memref<86xf32, #tpu.memory_space<smem>>
    %73 = vector.broadcast %72 : f32 to vector<1x128xf32>
    %74 = arith.mulf %5, %73 : vector<1x128xf32>
    %75 = arith.addf %71, %74 : vector<1x128xf32>
    %c38 = arith.constant 38 : index
    %76 = memref.load %arg1[%c38] : memref<86xf32, #tpu.memory_space<smem>>
    %77 = vector.broadcast %76 : f32 to vector<1x128xf32>
    %78 = arith.mulf %7, %77 : vector<1x128xf32>
    %79 = arith.addf %75, %78 : vector<1x128xf32>
    %cst_12 = arith.constant 0.000000e+00 : f32
    %80 = vector.broadcast %cst_12 : f32 to vector<1x128xf32>
    %81 = arith.maximumf %79, %80 : vector<1x128xf32>
    %c64 = arith.constant 64 : index
    %82 = memref.load %arg1[%c64] : memref<86xf32, #tpu.memory_space<smem>>
    %83 = vector.broadcast %82 : f32 to vector<1x128xf32>
    %84 = arith.mulf %81, %83 : vector<1x128xf32>
    %85 = arith.addf %57, %84 : vector<1x128xf32>
    %c65 = arith.constant 65 : index
    %86 = memref.load %arg1[%c65] : memref<86xf32, #tpu.memory_space<smem>>
    %87 = vector.broadcast %86 : f32 to vector<1x128xf32>
    %88 = arith.mulf %81, %87 : vector<1x128xf32>
    %89 = arith.addf %61, %88 : vector<1x128xf32>
    %c3_13 = arith.constant 3 : index
    %90 = memref.load %arg1[%c3_13] : memref<86xf32, #tpu.memory_space<smem>>
    %91 = vector.broadcast %90 : f32 to vector<1x128xf32>
    %92 = arith.mulf %1, %91 : vector<1x128xf32>
    %c51 = arith.constant 51 : index
    %93 = memref.load %arg1[%c51] : memref<86xf32, #tpu.memory_space<smem>>
    %94 = vector.broadcast %93 : f32 to vector<1x128xf32>
    %95 = arith.addf %92, %94 : vector<1x128xf32>
    %c15 = arith.constant 15 : index
    %96 = memref.load %arg1[%c15] : memref<86xf32, #tpu.memory_space<smem>>
    %97 = vector.broadcast %96 : f32 to vector<1x128xf32>
    %98 = arith.mulf %3, %97 : vector<1x128xf32>
    %99 = arith.addf %95, %98 : vector<1x128xf32>
    %c27 = arith.constant 27 : index
    %100 = memref.load %arg1[%c27] : memref<86xf32, #tpu.memory_space<smem>>
    %101 = vector.broadcast %100 : f32 to vector<1x128xf32>
    %102 = arith.mulf %5, %101 : vector<1x128xf32>
    %103 = arith.addf %99, %102 : vector<1x128xf32>
    %c39 = arith.constant 39 : index
    %104 = memref.load %arg1[%c39] : memref<86xf32, #tpu.memory_space<smem>>
    %105 = vector.broadcast %104 : f32 to vector<1x128xf32>
    %106 = arith.mulf %7, %105 : vector<1x128xf32>
    %107 = arith.addf %103, %106 : vector<1x128xf32>
    %cst_14 = arith.constant 0.000000e+00 : f32
    %108 = vector.broadcast %cst_14 : f32 to vector<1x128xf32>
    %109 = arith.maximumf %107, %108 : vector<1x128xf32>
    %c66 = arith.constant 66 : index
    %110 = memref.load %arg1[%c66] : memref<86xf32, #tpu.memory_space<smem>>
    %111 = vector.broadcast %110 : f32 to vector<1x128xf32>
    %112 = arith.mulf %109, %111 : vector<1x128xf32>
    %113 = arith.addf %85, %112 : vector<1x128xf32>
    %c67 = arith.constant 67 : index
    %114 = memref.load %arg1[%c67] : memref<86xf32, #tpu.memory_space<smem>>
    %115 = vector.broadcast %114 : f32 to vector<1x128xf32>
    %116 = arith.mulf %109, %115 : vector<1x128xf32>
    %117 = arith.addf %89, %116 : vector<1x128xf32>
    %c4 = arith.constant 4 : index
    %118 = memref.load %arg1[%c4] : memref<86xf32, #tpu.memory_space<smem>>
    %119 = vector.broadcast %118 : f32 to vector<1x128xf32>
    %120 = arith.mulf %1, %119 : vector<1x128xf32>
    %c52 = arith.constant 52 : index
    %121 = memref.load %arg1[%c52] : memref<86xf32, #tpu.memory_space<smem>>
    %122 = vector.broadcast %121 : f32 to vector<1x128xf32>
    %123 = arith.addf %120, %122 : vector<1x128xf32>
    %c16 = arith.constant 16 : index
    %124 = memref.load %arg1[%c16] : memref<86xf32, #tpu.memory_space<smem>>
    %125 = vector.broadcast %124 : f32 to vector<1x128xf32>
    %126 = arith.mulf %3, %125 : vector<1x128xf32>
    %127 = arith.addf %123, %126 : vector<1x128xf32>
    %c28 = arith.constant 28 : index
    %128 = memref.load %arg1[%c28] : memref<86xf32, #tpu.memory_space<smem>>
    %129 = vector.broadcast %128 : f32 to vector<1x128xf32>
    %130 = arith.mulf %5, %129 : vector<1x128xf32>
    %131 = arith.addf %127, %130 : vector<1x128xf32>
    %c40 = arith.constant 40 : index
    %132 = memref.load %arg1[%c40] : memref<86xf32, #tpu.memory_space<smem>>
    %133 = vector.broadcast %132 : f32 to vector<1x128xf32>
    %134 = arith.mulf %7, %133 : vector<1x128xf32>
    %135 = arith.addf %131, %134 : vector<1x128xf32>
    %cst_15 = arith.constant 0.000000e+00 : f32
    %136 = vector.broadcast %cst_15 : f32 to vector<1x128xf32>
    %137 = arith.maximumf %135, %136 : vector<1x128xf32>
    %c68 = arith.constant 68 : index
    %138 = memref.load %arg1[%c68] : memref<86xf32, #tpu.memory_space<smem>>
    %139 = vector.broadcast %138 : f32 to vector<1x128xf32>
    %140 = arith.mulf %137, %139 : vector<1x128xf32>
    %141 = arith.addf %113, %140 : vector<1x128xf32>
    %c69 = arith.constant 69 : index
    %142 = memref.load %arg1[%c69] : memref<86xf32, #tpu.memory_space<smem>>
    %143 = vector.broadcast %142 : f32 to vector<1x128xf32>
    %144 = arith.mulf %137, %143 : vector<1x128xf32>
    %145 = arith.addf %117, %144 : vector<1x128xf32>
    %c5 = arith.constant 5 : index
    %146 = memref.load %arg1[%c5] : memref<86xf32, #tpu.memory_space<smem>>
    %147 = vector.broadcast %146 : f32 to vector<1x128xf32>
    %148 = arith.mulf %1, %147 : vector<1x128xf32>
    %c53 = arith.constant 53 : index
    %149 = memref.load %arg1[%c53] : memref<86xf32, #tpu.memory_space<smem>>
    %150 = vector.broadcast %149 : f32 to vector<1x128xf32>
    %151 = arith.addf %148, %150 : vector<1x128xf32>
    %c17 = arith.constant 17 : index
    %152 = memref.load %arg1[%c17] : memref<86xf32, #tpu.memory_space<smem>>
    %153 = vector.broadcast %152 : f32 to vector<1x128xf32>
    %154 = arith.mulf %3, %153 : vector<1x128xf32>
    %155 = arith.addf %151, %154 : vector<1x128xf32>
    %c29 = arith.constant 29 : index
    %156 = memref.load %arg1[%c29] : memref<86xf32, #tpu.memory_space<smem>>
    %157 = vector.broadcast %156 : f32 to vector<1x128xf32>
    %158 = arith.mulf %5, %157 : vector<1x128xf32>
    %159 = arith.addf %155, %158 : vector<1x128xf32>
    %c41 = arith.constant 41 : index
    %160 = memref.load %arg1[%c41] : memref<86xf32, #tpu.memory_space<smem>>
    %161 = vector.broadcast %160 : f32 to vector<1x128xf32>
    %162 = arith.mulf %7, %161 : vector<1x128xf32>
    %163 = arith.addf %159, %162 : vector<1x128xf32>
    %cst_16 = arith.constant 0.000000e+00 : f32
    %164 = vector.broadcast %cst_16 : f32 to vector<1x128xf32>
    %165 = arith.maximumf %163, %164 : vector<1x128xf32>
    %c70 = arith.constant 70 : index
    %166 = memref.load %arg1[%c70] : memref<86xf32, #tpu.memory_space<smem>>
    %167 = vector.broadcast %166 : f32 to vector<1x128xf32>
    %168 = arith.mulf %165, %167 : vector<1x128xf32>
    %169 = arith.addf %141, %168 : vector<1x128xf32>
    %c71 = arith.constant 71 : index
    %170 = memref.load %arg1[%c71] : memref<86xf32, #tpu.memory_space<smem>>
    %171 = vector.broadcast %170 : f32 to vector<1x128xf32>
    %172 = arith.mulf %165, %171 : vector<1x128xf32>
    %173 = arith.addf %145, %172 : vector<1x128xf32>
    %c6 = arith.constant 6 : index
    %174 = memref.load %arg1[%c6] : memref<86xf32, #tpu.memory_space<smem>>
    %175 = vector.broadcast %174 : f32 to vector<1x128xf32>
    %176 = arith.mulf %1, %175 : vector<1x128xf32>
    %c54 = arith.constant 54 : index
    %177 = memref.load %arg1[%c54] : memref<86xf32, #tpu.memory_space<smem>>
    %178 = vector.broadcast %177 : f32 to vector<1x128xf32>
    %179 = arith.addf %176, %178 : vector<1x128xf32>
    %c18 = arith.constant 18 : index
    %180 = memref.load %arg1[%c18] : memref<86xf32, #tpu.memory_space<smem>>
    %181 = vector.broadcast %180 : f32 to vector<1x128xf32>
    %182 = arith.mulf %3, %181 : vector<1x128xf32>
    %183 = arith.addf %179, %182 : vector<1x128xf32>
    %c30 = arith.constant 30 : index
    %184 = memref.load %arg1[%c30] : memref<86xf32, #tpu.memory_space<smem>>
    %185 = vector.broadcast %184 : f32 to vector<1x128xf32>
    %186 = arith.mulf %5, %185 : vector<1x128xf32>
    %187 = arith.addf %183, %186 : vector<1x128xf32>
    %c42 = arith.constant 42 : index
    %188 = memref.load %arg1[%c42] : memref<86xf32, #tpu.memory_space<smem>>
    %189 = vector.broadcast %188 : f32 to vector<1x128xf32>
    %190 = arith.mulf %7, %189 : vector<1x128xf32>
    %191 = arith.addf %187, %190 : vector<1x128xf32>
    %cst_17 = arith.constant 0.000000e+00 : f32
    %192 = vector.broadcast %cst_17 : f32 to vector<1x128xf32>
    %193 = arith.maximumf %191, %192 : vector<1x128xf32>
    %c72 = arith.constant 72 : index
    %194 = memref.load %arg1[%c72] : memref<86xf32, #tpu.memory_space<smem>>
    %195 = vector.broadcast %194 : f32 to vector<1x128xf32>
    %196 = arith.mulf %193, %195 : vector<1x128xf32>
    %197 = arith.addf %169, %196 : vector<1x128xf32>
    %c73 = arith.constant 73 : index
    %198 = memref.load %arg1[%c73] : memref<86xf32, #tpu.memory_space<smem>>
    %199 = vector.broadcast %198 : f32 to vector<1x128xf32>
    %200 = arith.mulf %193, %199 : vector<1x128xf32>
    %201 = arith.addf %173, %200 : vector<1x128xf32>
    %c7 = arith.constant 7 : index
    %202 = memref.load %arg1[%c7] : memref<86xf32, #tpu.memory_space<smem>>
    %203 = vector.broadcast %202 : f32 to vector<1x128xf32>
    %204 = arith.mulf %1, %203 : vector<1x128xf32>
    %c55 = arith.constant 55 : index
    %205 = memref.load %arg1[%c55] : memref<86xf32, #tpu.memory_space<smem>>
    %206 = vector.broadcast %205 : f32 to vector<1x128xf32>
    %207 = arith.addf %204, %206 : vector<1x128xf32>
    %c19 = arith.constant 19 : index
    %208 = memref.load %arg1[%c19] : memref<86xf32, #tpu.memory_space<smem>>
    %209 = vector.broadcast %208 : f32 to vector<1x128xf32>
    %210 = arith.mulf %3, %209 : vector<1x128xf32>
    %211 = arith.addf %207, %210 : vector<1x128xf32>
    %c31 = arith.constant 31 : index
    %212 = memref.load %arg1[%c31] : memref<86xf32, #tpu.memory_space<smem>>
    %213 = vector.broadcast %212 : f32 to vector<1x128xf32>
    %214 = arith.mulf %5, %213 : vector<1x128xf32>
    %215 = arith.addf %211, %214 : vector<1x128xf32>
    %c43 = arith.constant 43 : index
    %216 = memref.load %arg1[%c43] : memref<86xf32, #tpu.memory_space<smem>>
    %217 = vector.broadcast %216 : f32 to vector<1x128xf32>
    %218 = arith.mulf %7, %217 : vector<1x128xf32>
    %219 = arith.addf %215, %218 : vector<1x128xf32>
    %cst_18 = arith.constant 0.000000e+00 : f32
    %220 = vector.broadcast %cst_18 : f32 to vector<1x128xf32>
    %221 = arith.maximumf %219, %220 : vector<1x128xf32>
    %c74 = arith.constant 74 : index
    %222 = memref.load %arg1[%c74] : memref<86xf32, #tpu.memory_space<smem>>
    %223 = vector.broadcast %222 : f32 to vector<1x128xf32>
    %224 = arith.mulf %221, %223 : vector<1x128xf32>
    %225 = arith.addf %197, %224 : vector<1x128xf32>
    %c75 = arith.constant 75 : index
    %226 = memref.load %arg1[%c75] : memref<86xf32, #tpu.memory_space<smem>>
    %227 = vector.broadcast %226 : f32 to vector<1x128xf32>
    %228 = arith.mulf %221, %227 : vector<1x128xf32>
    %229 = arith.addf %201, %228 : vector<1x128xf32>
    %c8 = arith.constant 8 : index
    %230 = memref.load %arg1[%c8] : memref<86xf32, #tpu.memory_space<smem>>
    %231 = vector.broadcast %230 : f32 to vector<1x128xf32>
    %232 = arith.mulf %1, %231 : vector<1x128xf32>
    %c56 = arith.constant 56 : index
    %233 = memref.load %arg1[%c56] : memref<86xf32, #tpu.memory_space<smem>>
    %234 = vector.broadcast %233 : f32 to vector<1x128xf32>
    %235 = arith.addf %232, %234 : vector<1x128xf32>
    %c20 = arith.constant 20 : index
    %236 = memref.load %arg1[%c20] : memref<86xf32, #tpu.memory_space<smem>>
    %237 = vector.broadcast %236 : f32 to vector<1x128xf32>
    %238 = arith.mulf %3, %237 : vector<1x128xf32>
    %239 = arith.addf %235, %238 : vector<1x128xf32>
    %c32 = arith.constant 32 : index
    %240 = memref.load %arg1[%c32] : memref<86xf32, #tpu.memory_space<smem>>
    %241 = vector.broadcast %240 : f32 to vector<1x128xf32>
    %242 = arith.mulf %5, %241 : vector<1x128xf32>
    %243 = arith.addf %239, %242 : vector<1x128xf32>
    %c44 = arith.constant 44 : index
    %244 = memref.load %arg1[%c44] : memref<86xf32, #tpu.memory_space<smem>>
    %245 = vector.broadcast %244 : f32 to vector<1x128xf32>
    %246 = arith.mulf %7, %245 : vector<1x128xf32>
    %247 = arith.addf %243, %246 : vector<1x128xf32>
    %cst_19 = arith.constant 0.000000e+00 : f32
    %248 = vector.broadcast %cst_19 : f32 to vector<1x128xf32>
    %249 = arith.maximumf %247, %248 : vector<1x128xf32>
    %c76 = arith.constant 76 : index
    %250 = memref.load %arg1[%c76] : memref<86xf32, #tpu.memory_space<smem>>
    %251 = vector.broadcast %250 : f32 to vector<1x128xf32>
    %252 = arith.mulf %249, %251 : vector<1x128xf32>
    %253 = arith.addf %225, %252 : vector<1x128xf32>
    %c77 = arith.constant 77 : index
    %254 = memref.load %arg1[%c77] : memref<86xf32, #tpu.memory_space<smem>>
    %255 = vector.broadcast %254 : f32 to vector<1x128xf32>
    %256 = arith.mulf %249, %255 : vector<1x128xf32>
    %257 = arith.addf %229, %256 : vector<1x128xf32>
    %c9 = arith.constant 9 : index
    %258 = memref.load %arg1[%c9] : memref<86xf32, #tpu.memory_space<smem>>
    %259 = vector.broadcast %258 : f32 to vector<1x128xf32>
    %260 = arith.mulf %1, %259 : vector<1x128xf32>
    %c57 = arith.constant 57 : index
    %261 = memref.load %arg1[%c57] : memref<86xf32, #tpu.memory_space<smem>>
    %262 = vector.broadcast %261 : f32 to vector<1x128xf32>
    %263 = arith.addf %260, %262 : vector<1x128xf32>
    %c21 = arith.constant 21 : index
    %264 = memref.load %arg1[%c21] : memref<86xf32, #tpu.memory_space<smem>>
    %265 = vector.broadcast %264 : f32 to vector<1x128xf32>
    %266 = arith.mulf %3, %265 : vector<1x128xf32>
    %267 = arith.addf %263, %266 : vector<1x128xf32>
    %c33 = arith.constant 33 : index
    %268 = memref.load %arg1[%c33] : memref<86xf32, #tpu.memory_space<smem>>
    %269 = vector.broadcast %268 : f32 to vector<1x128xf32>
    %270 = arith.mulf %5, %269 : vector<1x128xf32>
    %271 = arith.addf %267, %270 : vector<1x128xf32>
    %c45 = arith.constant 45 : index
    %272 = memref.load %arg1[%c45] : memref<86xf32, #tpu.memory_space<smem>>
    %273 = vector.broadcast %272 : f32 to vector<1x128xf32>
    %274 = arith.mulf %7, %273 : vector<1x128xf32>
    %275 = arith.addf %271, %274 : vector<1x128xf32>
    %cst_20 = arith.constant 0.000000e+00 : f32
    %276 = vector.broadcast %cst_20 : f32 to vector<1x128xf32>
    %277 = arith.maximumf %275, %276 : vector<1x128xf32>
    %c78 = arith.constant 78 : index
    %278 = memref.load %arg1[%c78] : memref<86xf32, #tpu.memory_space<smem>>
    %279 = vector.broadcast %278 : f32 to vector<1x128xf32>
    %280 = arith.mulf %277, %279 : vector<1x128xf32>
    %281 = arith.addf %253, %280 : vector<1x128xf32>
    %c79 = arith.constant 79 : index
    %282 = memref.load %arg1[%c79] : memref<86xf32, #tpu.memory_space<smem>>
    %283 = vector.broadcast %282 : f32 to vector<1x128xf32>
    %284 = arith.mulf %277, %283 : vector<1x128xf32>
    %285 = arith.addf %257, %284 : vector<1x128xf32>
    %c10 = arith.constant 10 : index
    %286 = memref.load %arg1[%c10] : memref<86xf32, #tpu.memory_space<smem>>
    %287 = vector.broadcast %286 : f32 to vector<1x128xf32>
    %288 = arith.mulf %1, %287 : vector<1x128xf32>
    %c58 = arith.constant 58 : index
    %289 = memref.load %arg1[%c58] : memref<86xf32, #tpu.memory_space<smem>>
    %290 = vector.broadcast %289 : f32 to vector<1x128xf32>
    %291 = arith.addf %288, %290 : vector<1x128xf32>
    %c22 = arith.constant 22 : index
    %292 = memref.load %arg1[%c22] : memref<86xf32, #tpu.memory_space<smem>>
    %293 = vector.broadcast %292 : f32 to vector<1x128xf32>
    %294 = arith.mulf %3, %293 : vector<1x128xf32>
    %295 = arith.addf %291, %294 : vector<1x128xf32>
    %c34 = arith.constant 34 : index
    %296 = memref.load %arg1[%c34] : memref<86xf32, #tpu.memory_space<smem>>
    %297 = vector.broadcast %296 : f32 to vector<1x128xf32>
    %298 = arith.mulf %5, %297 : vector<1x128xf32>
    %299 = arith.addf %295, %298 : vector<1x128xf32>
    %c46 = arith.constant 46 : index
    %300 = memref.load %arg1[%c46] : memref<86xf32, #tpu.memory_space<smem>>
    %301 = vector.broadcast %300 : f32 to vector<1x128xf32>
    %302 = arith.mulf %7, %301 : vector<1x128xf32>
    %303 = arith.addf %299, %302 : vector<1x128xf32>
    %cst_21 = arith.constant 0.000000e+00 : f32
    %304 = vector.broadcast %cst_21 : f32 to vector<1x128xf32>
    %305 = arith.maximumf %303, %304 : vector<1x128xf32>
    %c80 = arith.constant 80 : index
    %306 = memref.load %arg1[%c80] : memref<86xf32, #tpu.memory_space<smem>>
    %307 = vector.broadcast %306 : f32 to vector<1x128xf32>
    %308 = arith.mulf %305, %307 : vector<1x128xf32>
    %309 = arith.addf %281, %308 : vector<1x128xf32>
    %c81 = arith.constant 81 : index
    %310 = memref.load %arg1[%c81] : memref<86xf32, #tpu.memory_space<smem>>
    %311 = vector.broadcast %310 : f32 to vector<1x128xf32>
    %312 = arith.mulf %305, %311 : vector<1x128xf32>
    %313 = arith.addf %285, %312 : vector<1x128xf32>
    %c11 = arith.constant 11 : index
    %314 = memref.load %arg1[%c11] : memref<86xf32, #tpu.memory_space<smem>>
    %315 = vector.broadcast %314 : f32 to vector<1x128xf32>
    %316 = arith.mulf %1, %315 : vector<1x128xf32>
    %c59 = arith.constant 59 : index
    %317 = memref.load %arg1[%c59] : memref<86xf32, #tpu.memory_space<smem>>
    %318 = vector.broadcast %317 : f32 to vector<1x128xf32>
    %319 = arith.addf %316, %318 : vector<1x128xf32>
    %c23 = arith.constant 23 : index
    %320 = memref.load %arg1[%c23] : memref<86xf32, #tpu.memory_space<smem>>
    %321 = vector.broadcast %320 : f32 to vector<1x128xf32>
    %322 = arith.mulf %3, %321 : vector<1x128xf32>
    %323 = arith.addf %319, %322 : vector<1x128xf32>
    %c35 = arith.constant 35 : index
    %324 = memref.load %arg1[%c35] : memref<86xf32, #tpu.memory_space<smem>>
    %325 = vector.broadcast %324 : f32 to vector<1x128xf32>
    %326 = arith.mulf %5, %325 : vector<1x128xf32>
    %327 = arith.addf %323, %326 : vector<1x128xf32>
    %c47 = arith.constant 47 : index
    %328 = memref.load %arg1[%c47] : memref<86xf32, #tpu.memory_space<smem>>
    %329 = vector.broadcast %328 : f32 to vector<1x128xf32>
    %330 = arith.mulf %7, %329 : vector<1x128xf32>
    %331 = arith.addf %327, %330 : vector<1x128xf32>
    %cst_22 = arith.constant 0.000000e+00 : f32
    %332 = vector.broadcast %cst_22 : f32 to vector<1x128xf32>
    %333 = arith.maximumf %331, %332 : vector<1x128xf32>
    %c82 = arith.constant 82 : index
    %334 = memref.load %arg1[%c82] : memref<86xf32, #tpu.memory_space<smem>>
    %335 = vector.broadcast %334 : f32 to vector<1x128xf32>
    %336 = arith.mulf %333, %335 : vector<1x128xf32>
    %337 = arith.addf %309, %336 : vector<1x128xf32>
    %c83 = arith.constant 83 : index
    %338 = memref.load %arg1[%c83] : memref<86xf32, #tpu.memory_space<smem>>
    %339 = vector.broadcast %338 : f32 to vector<1x128xf32>
    %340 = arith.mulf %333, %339 : vector<1x128xf32>
    %341 = arith.addf %313, %340 : vector<1x128xf32>
    %c84 = arith.constant 84 : index
    %342 = memref.load %arg1[%c84] : memref<86xf32, #tpu.memory_space<smem>>
    %343 = vector.broadcast %342 : f32 to vector<1x128xf32>
    %344 = arith.addf %337, %343 : vector<1x128xf32>
    %c0_23 = arith.constant 0 : index
    %c0_24 = arith.constant 0 : index
    %c0_25 = arith.constant 0 : index
    %345 = vector.load %arg3[%c0_23, %c0_24, %c0_25] : memref<2x1x128xf32, #tpu.memory_space<vmem>>, vector<1x1x128xf32>
    %346 = vector.shape_cast %345 : vector<1x1x128xf32> to vector<1x128xf32>
    %347 = vector.shape_cast %344 : vector<1x128xf32> to vector<1x1x128xf32>
    tpu.vector_store %arg3[%c0_23, %c0_24, %c0_25], %347 {strides = array<i32>} : memref<2x1x128xf32, #tpu.memory_space<vmem>>, vector<1x1x128xf32>,
    %c85 = arith.constant 85 : index
    %348 = memref.load %arg1[%c85] : memref<86xf32, #tpu.memory_space<smem>>
    %349 = vector.broadcast %348 : f32 to vector<1x128xf32>
    %350 = arith.addf %341, %349 : vector<1x128xf32>
    %c1_26 = arith.constant 1 : index
    %c0_27 = arith.constant 0 : index
    %c0_28 = arith.constant 0 : index
    %351 = vector.load %arg3[%c1_26, %c0_27, %c0_28] : memref<2x1x128xf32, #tpu.memory_space<vmem>>, vector<1x1x128xf32>
    %352 = vector.shape_cast %351 : vector<1x1x128xf32> to vector<1x128xf32>
    %353 = vector.shape_cast %350 : vector<1x128xf32> to vector<1x1x128xf32>
    tpu.vector_store %arg3[%c1_26, %c0_27, %c0_28], %353 {strides = array<i32>} : memref<2x1x128xf32, #tpu.memory_space<vmem>>, vector<1x1x128xf32>,
    return
  }
  func.func @transform_0(%arg0: i32) -> i32 {
    %c0_i32 = arith.constant 0 : i32
    %c0_i32_0 = arith.constant 0 : i32
    return %c0_i32 : i32
  }
  func.func @transform_1(%arg0: i32) -> (i32, i32, i32) {
    %c0_i32 = arith.constant 0 : i32
    %c0_i32_0 = arith.constant 0 : i32
    %c0_i32_1 = arith.constant 0 : i32
    return %c0_i32, %arg0, %c0_i32_0 : i32, i32, i32
  }
  func.func @transform_2(%arg0: i32) -> (i32, i32, i32) {
    %c0_i32 = arith.constant 0 : i32
    %c0_i32_0 = arith.constant 0 : i32
    %c0_i32_1 = arith.constant 0 : i32
    return %c0_i32, %arg0, %c0_i32_0 : i32, i32, i32
  }
}

</mosaic_0001>

<bundles_post_ra>
// kernel: cartpole_dqn_forward_packed.1
= control target key start
LH: loop header
LB: loop body
LE: loop exit
PB: predicated region body
PF: predicated region fallthrough
CT: control target
= control target key end

     0   :  { %7 = vsyncpa [#allocation3], 0  ;;  %s789_s0 = inlined_call_operand.vmem [shape: f32[86], index: 0, kind: input, shape index: {}]   ;;  %s790_s1 = inlined_call_operand.vmem [shape: f32[4,1,128], index: 1, kind: input, shape index: {}]   ;;  %s791_s2 = inlined_call_operand.vmem [shape: f32[2,1,128], index: 2, kind: output, shape index: {}]  }
   0x1   :  { %s14_s11 = sshll.u32 %s789_s0, 4  ;;  %s15_s11 = int_to_ptr.vmem [resolvable:$true] %s14_s11 }
   0x2   :  { %s457_s12 = scalar_lea.vmem %s15_s11, 16  ;;  %p462_p1 = scmp.lt.s32.totalorder %s15_s11, %s15_s11 }
   0x3   :  { %p458_p0 = scmp.ne.s32.totalorder %s15_s11, %s457_s12  ;;  %p463_p2 = scmp.lt.s32.totalorder %s457_s12, %s457_s12 }
   0x5   :  { %p464_p3 = por %p463_p2, %p462_p1 }
   0x7   :  { %p465_p4 = pnand %p464_p3, %p458_p0 }
   0x9   :  { %468 = shalt.err (!%p465_p4)
}
   0xa   :  { %s471_s13 = smov [#allocation2]  }
   0xb   :  { %17 = dma.vmem_to_smem %s15_s11, 16, %s471_s13, [#allocation3]  }
   0xc   :  { %469 = dma.done.wait [#allocation3], 16  }
   0xd   :  { %470 = vsyncadd [#allocation3], 4294967280 }
   0xe   :  { %23 = sfence }
   0xf   :  { %s31_s14 = sld [smem:[#allocation2]]  ;;  %s371_s16 = sld [smem:[#allocation2 + $0xc]]  ;;  %v497_v0 = vld [vmem:[%s790_s1] sm:$0x1]  ;;  %v504_v1 = vld [vmem:[%s790_s1 + $0x1] sm:$0x1] }
  0x10   :  { %s370_s15 = sld [smem:[#allocation2 + $0x30]]  ;;  %s373_s18 = sld [smem:[#allocation2 + $0x24]]  ;;  %v513_v2 = vld [vmem:[%s790_s1 + $0x2] sm:$0x1]  ;;  %v522_v5 = vld [vmem:[%s790_s1 + $0x3] sm:$0x1] }
  0x11   :  { %s372_s17 = sld [smem:[#allocation2 + $0x18]]  ;;  %s490_s19 = sld [smem:[#allocation2 + $0x3c]] }
  0x12   :  { %s492_s0 = sld [smem:[#allocation2 + $0x3d]]  ;;  %s376_s20 = sld [smem:[#allocation2 + $0x1]] }
  0x13   :  { %s499_s23 = sld [smem:[#allocation2 + $0x31]]  ;;  %s378_s24 = sld [smem:[#allocation2 + $0xd]] }
  0x14   :  { %s506_s27 = sld [smem:[#allocation2 + $0x19]]  ;;  %s508_s28 = sld [smem:[#allocation2 + $0x25]] }
  0x15   :  { %v32_v3 = vstv %s31_s14  ;;  %s515_s3 = sld [smem:[#allocation2 + $0x3e]]  ;;  %s517_s4 = sld [smem:[#allocation2 + $0x3f]]  ;;  %v38_v7 = vstv %s371_s16 }
  0x16   :  { %v35_v4 = vstv %s370_s15  ;;  %v33_v6 = vmul.f32 %v32_v3, %v497_v0  ;;  %s525_s7 = sld [smem:[#allocation2 + $0x2]]  ;;  %v39_v9 = vmul.f32 %v504_v1, %v38_v7  ;;  %v46_v10 = vstv %s373_s18  ;;  %s530_s9 = sld [smem:[#allocation2 + $0xe]] }
  0x17   :  { %v42_v8 = vstv %s372_s17  ;;  %s527_s8 = sld [smem:[#allocation2 + $0x32]]  ;;  %s535_s1 = sld [smem:[#allocation2 + $0x26]]  ;;  %v47_v14 = vmul.f32 %v522_v5, %v46_v10  ;;  %v51_v22 = vstv %s490_s19 }
  0x18   :  { %s532_s10 = sld [smem:[#allocation2 + $0x1a]]  ;;  %v36_v11 = vadd.f32 %v35_v4, %v33_v6  ;;  %v43_v12 = vmul.f32 %v513_v2, %v42_v8  ;;  %v57_v13 = vstv %s376_s20  ;;  %s540_s11 = sld [smem:[#allocation2 + $0x3]]  ;;  %v54_v23 = vstv %s492_s0 }
  0x19   :  { %v58_v15 = vmul.f32 %v57_v13, %v497_v0  ;;  %v60_v16 = vstv %s499_s23  ;;  %v63_v17 = vstv %s378_s24  ;;  %s545_s12 = sld [smem:[#allocation2 + $0x33]]  ;;  %s547_s13 = sld [smem:[#allocation2 + $0xf]] }
  0x1a   :  { %v40_v18 = vadd.f32 %v39_v9, %v36_v11  ;;  %v64_v19 = vmul.f32 %v504_v1, %v63_v17  ;;  %v67_v20 = vstv %s506_s27  ;;  %v71_v21 = vstv %s508_s28  ;;  %s552_s14 = sld [smem:[#allocation2 + $0x40]]  ;;  %s554_s15 = sld [smem:[#allocation2 + $0x1b]] }
  0x1b   :  { %v61_v24 = vadd.f32 %v60_v16, %v58_v15  ;;  %v68_v25 = vmul.f32 %v513_v2, %v67_v20  ;;  %v72_v27 = vmul.f32 %v522_v5, %v71_v21  ;;  %s559_s16 = sld [smem:[#allocation2 + $0x41]]  ;;  %s561_s17 = sld [smem:[#allocation2 + $0x27]]  ;;  %v76_v35 = vstv %s515_s3 }
  0x1c   :  { %v44_v26 = vadd.f32 %v43_v12, %v40_v18  ;;  %v84_v28 = vstv %s525_s7  ;;  %v90_v32 = vstv %s530_s9  ;;  %s566_s18 = sld [smem:[#allocation2 + $0x4]]  ;;  %s573_s0 = sld [smem:[#allocation2 + $0x10]]  ;;  %v80_v39 = vstv %s517_s4 }
  0x1d   :  { %v87_v29 = vstv %s527_s8  ;;  %v65_v30 = vadd.f32 %v64_v19, %v61_v24  ;;  %v85_v31 = vmul.f32 %v84_v28, %v497_v0  ;;  %v91_v36 = vmul.f32 %v504_v1, %v90_v32  ;;  %s571_s19 = sld [smem:[#allocation2 + $0x34]]  ;;  %s582_s21 = sld [smem:[#allocation2 + $0x28]] }
  0x1e   :  { %v94_v33 = vstv %s532_s10  ;;  %v48_v34 = vadd.f32 %v47_v14, %v44_v26  ;;  %v98_v37 = vstv %s535_s1  ;;  %v111_v44 = vstv %s540_s11  ;;  %s580_s20 = sld [smem:[#allocation2 + $0x1c]]  ;;  %s588_s22 = sld [smem:[#allocation2 + $0x42]] }
  0x1f   :  { %v69_v38 = vadd.f32 %v68_v25, %v65_v30  ;;  %v88_v40 = vadd.f32 %v87_v29, %v85_v31  ;;  %v95_v41 = vmul.f32 %v513_v2, %v94_v33  ;;  %v99_v43 = vmul.f32 %v522_v5, %v98_v37  ;;  %s590_s23 = sld [smem:[#allocation2 + $0x43]]  ;;  %s593_s24 = sld [smem:[#allocation2 + $0x5]] }
  0x20   :  { %v49_v42 = vmax.f32 %v48_v34, 0.0  ;;  %v114_v45 = vstv %s545_s12  ;;  %v112_v48 = vmul.f32 %v111_v44, %v497_v0  ;;  %v117_v49 = vstv %s547_s13  ;;  %s599_s25 = sld [smem:[#allocation2 + $0x35]]  ;;  %s601_s26 = sld [smem:[#allocation2 + $0x11]] }
  0x21   :  { %v73_v46 = vadd.f32 %v72_v27, %v69_v38  ;;  %v92_v47 = vadd.f32 %v91_v36, %v88_v40  ;;  %v118_v52 = vmul.f32 %v504_v1, %v117_v49  ;;  %v121_v53 = vstv %s554_s15  ;;  %s603_s27 = sld [smem:[#allocation2 + $0x1d]]  ;;  %s609_s28 = sld [smem:[#allocation2 + $0x29]] }
  0x22   :  { %v52_v50 = vmul.f32 %v51_v22, %v49_v42  ;;  %v55_v51 = vmul.f32 %v54_v23, %v49_v42  ;;  %v115_v56 = vadd.f32 %v114_v45, %v112_v48  ;;  %v122_v57 = vmul.f32 %v513_v2, %v121_v53  ;;  %s611_s29 = sld [smem:[#allocation2 + $0x44]]  ;;  %s613_s30 = sld [smem:[#allocation2 + $0x45]] }
  0x23   :  { %v74_v54 = vmax.f32 %v73_v46, 0.0  ;;  %v96_v55 = vadd.f32 %v95_v41, %v92_v47  ;;  %v103_v58 = vstv %s552_s14  ;;  %v107_v59 = vstv %s559_s16  ;;  %s618_s3 = sld [smem:[#allocation2 + $0x6]]  ;;  %s623_s5 = sld [smem:[#allocation2 + $0x12]] }
  0x24   :  { %v125_v60 = vstv %s561_s17  ;;  %v138_v61 = vstv %s566_s18  ;;  %v119_v4 = vadd.f32 %v118_v52, %v115_v56  ;;  %v141_v8 = vstv %s571_s19  ;;  %s620_s4 = sld [smem:[#allocation2 + $0x36]]  ;;  %s633_s8 = sld [smem:[#allocation2 + $0x2a]] }
  0x25   :  { %v77_v62 = vmul.f32 %v76_v35, %v74_v54  ;;  %v81_v63 = vmul.f32 %v80_v39, %v74_v54  ;;  %v100_v3 = vadd.f32 %v99_v43, %v96_v55  ;;  %v126_v6 = vmul.f32 %v522_v5, %v125_v60  ;;  %s625_s6 = sld [smem:[#allocation2 + $0x1e]]  ;;  %s638_s9 = sld [smem:[#allocation2 + $0x47]] }
  0x26   :  { %v139_v7 = vmul.f32 %v138_v61, %v497_v0  ;;  %v144_v9 = vstv %s573_s0  ;;  %v123_v13 = vadd.f32 %v122_v57, %v119_v4  ;;  %v148_v16 = vstv %s580_s20  ;;  %s631_s7 = sld [smem:[#allocation2 + $0x46]]  ;;  %s642_s10 = sld [smem:[#allocation2 + $0x7]] }
  0x27   :  { %v78_v10 = vadd.f32 %v77_v62, %v52_v50  ;;  %v82_v11 = vadd.f32 %v81_v63, %v55_v51  ;;  %v101_v12 = vmax.f32 %v100_v3, 0.0  ;;  %v145_v15 = vmul.f32 %v504_v1, %v144_v9  ;;  %s644_s1 = sld [smem:[#allocation2 + $0x37]]  ;;  %s648_s11 = sld [smem:[#allocation2 + $0x13]] }
  0x28   :  { %v142_v14 = vadd.f32 %v141_v8, %v139_v7  ;;  %v152_v17 = vstv %s582_s21  ;;  %v127_v20 = vadd.f32 %v126_v6, %v123_v13  ;;  %v149_v21 = vmul.f32 %v513_v2, %v148_v16  ;;  %s650_s12 = sld [smem:[#allocation2 + $0x1f]]  ;;  %s654_s13 = sld [smem:[#allocation2 + $0x48]] }
  0x29   :  { %v104_v18 = vmul.f32 %v103_v58, %v101_v12  ;;  %v108_v19 = vmul.f32 %v107_v59, %v101_v12  ;;  %v130_v22 = vstv %s588_s22  ;;  %v134_v23 = vstv %s590_s23  ;;  %s656_s14 = sld [smem:[#allocation2 + $0x2b]]  ;;  %s664_s15 = sld [smem:[#allocation2 + $0x49]] }
  0x2a   :  { %v146_v24 = vadd.f32 %v145_v15, %v142_v14  ;;  %v153_v25 = vmul.f32 %v522_v5, %v152_v17  ;;  %v128_v28 = vmax.f32 %v127_v20, 0.0  ;;  %v165_v29 = vstv %s593_s24  ;;  %s666_s16 = sld [smem:[#allocation2 + $0x8]]  ;;  %s674_s18 = sld [smem:[#allocation2 + $0x14]] }
  0x2b   :  { %v105_v26 = vadd.f32 %v104_v18, %v78_v10  ;;  %v109_v27 = vadd.f32 %v108_v19, %v82_v11  ;;  %v166_v31 = vmul.f32 %v165_v29, %v497_v0  ;;  %v168_v32 = vstv %s599_s25  ;;  %s669_s17 = sld [smem:[#allocation2 + $0x38]]  ;;  %s682_s0 = sld [smem:[#allocation2 + $0x2c]] }
  0x2c   :  { %v150_v30 = vadd.f32 %v149_v21, %v146_v24  ;;  %v171_v33 = vstv %s601_s26  ;;  %v131_v34 = vmul.f32 %v130_v22, %v128_v28  ;;  %v135_v35 = vmul.f32 %v134_v23, %v128_v28  ;;  %s676_s19 = sld [smem:[#allocation2 + $0x20]]  ;;  %s687_s20 = sld [smem:[#allocation2 + $0x4a]] }
  0x2d   :  { %v172_v36 = vmul.f32 %v504_v1, %v171_v33  ;;  %v175_v37 = vstv %s603_s27  ;;  %v169_v39 = vadd.f32 %v168_v32, %v166_v31  ;;  %v179_v41 = vstv %s609_s28  ;;  %s689_s21 = sld [smem:[#allocation2 + $0x4b]]  ;;  %s694_s22 = sld [smem:[#allocation2 + $0x9]] }
  0x2e   :  { %v154_v38 = vadd.f32 %v153_v25, %v150_v30  ;;  %v176_v40 = vmul.f32 %v513_v2, %v175_v37  ;;  %v132_v42 = vadd.f32 %v131_v34, %v105_v26  ;;  %v157_v43 = vstv %s611_s29  ;;  %s696_s23 = sld [smem:[#allocation2 + $0x39]]  ;;  %s699_s24 = sld [smem:[#allocation2 + $0x15]] }
  0x2f   :  { %v161_v44 = vstv %s613_s30  ;;  %v173_v46 = vadd.f32 %v172_v36, %v169_v39  ;;  %v180_v47 = vmul.f32 %v522_v5, %v179_v41  ;;  %v192_v48 = vstv %s618_s3  ;;  %s703_s25 = sld [smem:[#allocation2 + $0x21]]  ;;  %s705_s26 = sld [smem:[#allocation2 + $0x2d]] }
  0x30   :  { %v155_v45 = vmax.f32 %v154_v38, 0.0  ;;  %v193_v49 = vmul.f32 %v192_v48, %v497_v0  ;;  %v195_v50 = vstv %s620_s4  ;;  %v198_v51 = vstv %s623_s5  ;;  %s709_s27 = sld [smem:[#allocation2 + $0x4c]]  ;;  %s714_s28 = sld [smem:[#allocation2 + $0x4d]] }
  0x31   :  { %v202_v52 = vstv %s625_s6  ;;  %v136_v53 = vadd.f32 %v135_v35, %v109_v27  ;;  %v177_v55 = vadd.f32 %v176_v40, %v173_v46  ;;  %v199_v56 = vmul.f32 %v504_v1, %v198_v51  ;;  %s716_s29 = sld [smem:[#allocation2 + $0xa]]  ;;  %s723_s3 = sld [smem:[#allocation2 + $0x16]] }
  0x32   :  { %v158_v54 = vmul.f32 %v157_v43, %v155_v45  ;;  %v184_v57 = vstv %s631_s7  ;;  %v196_v58 = vadd.f32 %v195_v50, %v193_v49  ;;  %v203_v59 = vmul.f32 %v513_v2, %v202_v52  ;;  %s720_s30 = sld [smem:[#allocation2 + $0x3a]]  ;;  %s732_s5 = sld [smem:[#allocation2 + $0x2e]] }
  0x33   :  { %v206_v60 = vstv %s633_s8  ;;  %v162_v62 = vmul.f32 %v161_v44, %v155_v45  ;;  %v181_v63 = vadd.f32 %v180_v47, %v177_v55  ;;  %v188_v3 = vstv %s638_s9  ;;  %s725_s4 = sld [smem:[#allocation2 + $0x22]]  ;;  %s736_s6 = sld [smem:[#allocation2 + $0x4e]] }
  0x34   :  { %v159_v61 = vadd.f32 %v158_v54, %v132_v42  ;;  %v200_v4 = vadd.f32 %v199_v56, %v196_v58  ;;  %v207_v6 = vmul.f32 %v522_v5, %v206_v60  ;;  %v219_v7 = vstv %s642_s10  ;;  %s738_s7 = sld [smem:[#allocation2 + $0x4f]]  ;;  %s743_s8 = sld [smem:[#allocation2 + $0xb]] }
  0x35   :  { %v222_v8 = vstv %s644_s1  ;;  %v182_v9 = vmax.f32 %v181_v63, 0.0  ;;  %v220_v10 = vmul.f32 %v219_v7, %v497_v0  ;;  %v225_v11 = vstv %s648_s11  ;;  %s745_s9 = sld [smem:[#allocation2 + $0x3b]]  ;;  %s747_s10 = sld [smem:[#allocation2 + $0x17]] }
  0x36   :  { %v229_v12 = vstv %s650_s12  ;;  %v204_v13 = vadd.f32 %v203_v59, %v200_v4  ;;  %v211_v14 = vstv %s654_s13  ;;  %v226_v15 = vmul.f32 %v504_v1, %v225_v11  ;;  %s749_s1 = sld [smem:[#allocation2 + $0x23]]  ;;  %s755_s11 = sld [smem:[#allocation2 + $0x2f]] }
  0x37   :  { %v233_v16 = vstv %s656_s14  ;;  %v163_v17 = vadd.f32 %v162_v62, %v136_v53  ;;  %v185_v18 = vmul.f32 %v184_v57, %v182_v9  ;;  %v223_v19 = vadd.f32 %v222_v8, %v220_v10  ;;  %s763_s12 = sld [smem:[#allocation2 + $0x50]]  ;;  %s765_s13 = sld [smem:[#allocation2 + $0x51]] }
  0x38   :  { %v230_v20 = vmul.f32 %v513_v2, %v229_v12  ;;  %v189_v21 = vmul.f32 %v188_v3, %v182_v9  ;;  %v208_v22 = vadd.f32 %v207_v6, %v204_v13  ;;  %v215_v23 = vstv %s664_s15  ;;  %s451_s14 = sld [smem:[#allocation2 + $0x52]]  ;;  %s452_s15 = sld [smem:[#allocation2 + $0x53]] }
  0x39   :  { %v246_v24 = vstv %s666_s16  ;;  %v186_v25 = vadd.f32 %v185_v18, %v159_v61  ;;  %v227_v26 = vadd.f32 %v226_v15, %v223_v19  ;;  %v234_v27 = vmul.f32 %v522_v5, %v233_v16  ;;  %s453_s16 = sld [smem:[#allocation2 + $0x54]] }
  0x3a   :  { %v247_v28 = vmul.f32 %v246_v24, %v497_v0  ;;  %v209_v29 = vmax.f32 %v208_v22, 0.0  ;;  %v249_v30 = vstv %s669_s17  ;;  %v252_v31 = vstv %s674_s18  ;;  %s454_s17 = sld [smem:[#allocation2 + $0x55]] }
  0x3b   :  { %v256_v32 = vstv %s676_s19  ;;  %v231_v33 = vadd.f32 %v230_v20, %v227_v26  ;;  %v253_v35 = vmul.f32 %v504_v1, %v252_v31  ;;  %v190_v37 = vadd.f32 %v189_v21, %v163_v17 }
  0x3c   :  { %v250_v34 = vadd.f32 %v249_v30, %v247_v28  ;;  %v257_v36 = vmul.f32 %v513_v2, %v256_v32  ;;  %v212_v38 = vmul.f32 %v211_v14, %v209_v29  ;;  %v216_v39 = vmul.f32 %v215_v23, %v209_v29 }
  0x3d   :  { %v260_v40 = vstv %s682_s0  ;;  %v235_v41 = vadd.f32 %v234_v27, %v231_v33  ;;  %v238_v42 = vstv %s687_s20  ;;  %v242_v46 = vstv %s689_s21 }
  0x3e   :  { %v254_v43 = vadd.f32 %v253_v35, %v250_v34  ;;  %v261_v44 = vmul.f32 %v522_v5, %v260_v40  ;;  %v213_v45 = vadd.f32 %v212_v38, %v186_v25  ;;  %v273_v47 = vstv %s694_s22 }
  0x3f   :  { %v276_v48 = vstv %s696_s23  ;;  %v236_v49 = vmax.f32 %v235_v41, 0.0  ;;  %v274_v51 = vmul.f32 %v273_v47, %v497_v0  ;;  %v279_v52 = vstv %s699_s24 }
  0x40   :  { %v258_v50 = vadd.f32 %v257_v36, %v254_v43  ;;  %v217_v53 = vadd.f32 %v216_v39, %v190_v37  ;;  %v280_v54 = vmul.f32 %v504_v1, %v279_v52  ;;  %v283_v55 = vstv %s703_s25 }
  0x41   :  { %v287_v56 = vstv %s705_s26  ;;  %v239_v57 = vmul.f32 %v238_v42, %v236_v49  ;;  %v243_v58 = vmul.f32 %v242_v46, %v236_v49  ;;  %v277_v60 = vadd.f32 %v276_v48, %v274_v51 }
  0x42   :  { %v262_v59 = vadd.f32 %v261_v44, %v258_v50  ;;  %v265_v61 = vstv %s709_s27  ;;  %v269_v62 = vstv %s714_s28  ;;  %v284_v63 = vmul.f32 %v513_v2, %v283_v55 }
  0x43   :  { %v300_v3 = vstv %s716_s29  ;;  %v240_v4 = vadd.f32 %v239_v57, %v213_v45  ;;  %v281_v7 = vadd.f32 %v280_v54, %v277_v60  ;;  %v288_v8 = vmul.f32 %v522_v5, %v287_v56 }
  0x44   :  { %v263_v6 = vmax.f32 %v262_v59, 0.0  ;;  %v301_v9 = vmul.f32 %v300_v3, %v497_v0  ;;  %v303_v10 = vstv %s720_s30  ;;  %v306_v11 = vstv %s723_s3 }
  0x45   :  { %v310_v12 = vstv %s725_s4  ;;  %v244_v13 = vadd.f32 %v243_v58, %v217_v53  ;;  %v285_v15 = vadd.f32 %v284_v63, %v281_v7  ;;  %v307_v16 = vmul.f32 %v504_v1, %v306_v11 }
  0x46   :  { %v266_v14 = vmul.f32 %v265_v61, %v263_v6  ;;  %v270_v17 = vmul.f32 %v269_v62, %v263_v6  ;;  %v304_v18 = vadd.f32 %v303_v10, %v301_v9  ;;  %v311_v19 = vmul.f32 %v513_v2, %v310_v12 }
  0x47   :  { %v314_v20 = vstv %s732_s5  ;;  %v289_v22 = vadd.f32 %v288_v8, %v285_v15  ;;  %v292_v23 = vstv %s736_s6  ;;  %v296_v24 = vstv %s738_s7 }
  0x48   :  { %v267_v21 = vadd.f32 %v266_v14, %v240_v4  ;;  %v308_v25 = vadd.f32 %v307_v16, %v304_v18  ;;  %v315_v26 = vmul.f32 %v522_v5, %v314_v20  ;;  %v327_v27 = vstv %s743_s8 }
  0x49   :  { %v330_v28 = vstv %s745_s9  ;;  %v290_v29 = vmax.f32 %v289_v22, 0.0  ;;  %v328_v30 = vmul.f32 %v327_v27, %v497_v0  ;;  %v333_v31 = vstv %s747_s10 }
  0x4a   :  { %v337_v32 = vstv %s749_s1  ;;  %v271_v33 = vadd.f32 %v270_v17, %v244_v13  ;;  %v312_v34 = vadd.f32 %v311_v19, %v308_v25  ;;  %v334_v35 = vmul.f32 %v504_v1, %v333_v31 }
  0x4b   :  { %v341_v36 = vstv %s755_s11  ;;  %v293_v37 = vmul.f32 %v292_v23, %v290_v29  ;;  %v297_v38 = vmul.f32 %v296_v24, %v290_v29  ;;  %v331_v39 = vadd.f32 %v330_v28, %v328_v30 }
  0x4c   :  { %v338_v40 = vmul.f32 %v513_v2, %v337_v32  ;;  %v316_v41 = vadd.f32 %v315_v26, %v312_v34  ;;  %v319_v42 = vstv %s763_s12  ;;  %v323_v43 = vstv %s765_s13 }
  0x4d   :  { %v335_v44 = vadd.f32 %v334_v35, %v331_v39  ;;  %v342_v0 = vmul.f32 %v522_v5, %v341_v36  ;;  %v294_v46 = vadd.f32 %v293_v37, %v267_v21  ;;  %v298_v47 = vadd.f32 %v297_v38, %v271_v33 }
  0x4e   :  { %v317_v45 = vmax.f32 %v316_v41, 0.0  ;;  %v346_v51 = vstv %s451_s14  ;;  %v350_v52 = vstv %s452_s15  ;;  %v354_v57 = vstv %s453_s16 }
  0x4f   :  { %v339_v1 = vadd.f32 %v338_v40, %v335_v44  ;;  %v358_v58 = vstv %s454_s17 }
  0x50   :  { %v320_v48 = vmul.f32 %v319_v42, %v317_v45  ;;  %v324_v49 = vmul.f32 %v323_v43, %v317_v45 }
  0x51   :  { %v343_v50 = vadd.f32 %v342_v0, %v339_v1 }
  0x52   :  { %v321_v53 = vadd.f32 %v320_v48, %v294_v46  ;;  %v325_v54 = vadd.f32 %v324_v49, %v298_v47 }
  0x53   :  { %v344_v2 = vmax.f32 %v343_v50, 0.0 }
  0x55   :  { %v347_v55 = vmul.f32 %v346_v51, %v344_v2  ;;  %v351_v56 = vmul.f32 %v350_v52, %v344_v2 }
  0x57   :  { %v348_v59 = vadd.f32 %v347_v55, %v321_v53  ;;  %v352_v5 = vadd.f32 %v351_v56, %v325_v54 }
  0x59   :  { %v355_v60 = vadd.f32 %v354_v57, %v348_v59  ;;  %v359_v61 = vadd.f32 %v358_v58, %v352_v5 }
  0x5b   :  { %356 = vst [vmem:[%s791_s2] sm:$0x1] %v355_v60  ;;  %455 = vst [vmem:[%s791_s2 + $0x1] sm:$0x1] %v359_v61 }
  0x5c   :  { %366 = vsyncpa [#allocation3], 1 }

</bundles_post_ra>
